<compile_context>
chip_gen: v6e
topology: v6e:2x2x1
jax: 0.10.0
libtpu: 0.0.40
codegen_flags: <defaults>
</compile_context>

<pallas_src>
import functools
import math

import jax
import jax.numpy as jnp
from jax import lax
from jax.experimental import pallas as pl
from jax.experimental.pallas import tpu as pltpu


# ---------------------------------------------------------------------------
# Kernel
# ---------------------------------------------------------------------------
def _sdpa_kernel(q_ref, k_ref, v_ref, mask_ref, ctx_ref, attn_ref, *,
                 scale, approx_recip):
    # Blocks: q (1, TQ, d_k), k (1, S, d_k), v (1, S, d_v), mask (1, TQ, S).
    q = q_ref[0] * scale        # 1/sqrt(d_K) applied to Q (TQ*d), not scores (TQ*S)
    k = k_ref[0]                # (S,  d_k)  compute dtype
    v = v_ref[0]                # (S,  d_v)  compute dtype
    mask = mask_ref[0]          # (TQ, S)    int8, nonzero = masked out

    # scores = (Q*scale) @ K^T — contraction over the head dim (no explicit
    # transpose of K before the MXU push), f32 accumulation.
    scores = lax.dot_general(
        q, k,
        dimension_numbers=(((1,), (1,)), ((), ())),
        preferred_element_type=jnp.float32,
    )                                                        # (TQ, S) f32

    # masked_fill_(mask, -1e9)
    scores = jnp.where(mask != 0, jnp.float32(-1.0e9), scores)

    # Numerically-stabilized softmax over the key axis, all in f32.
    m = jnp.max(scores, axis=-1, keepdims=True)
    e = jnp.exp(scores - m)
    denom = jnp.sum(e, axis=-1, keepdims=True)
    inv = pl.reciprocal(denom, approx=approx_recip)          # EUP slot when approx

    # Single low-precision probability tensor, reused for both the context
    # matmul and the attention writeback (one cast pass instead of two).
    p = (e * inv).astype(v.dtype)                            # (TQ, S)

    ctx = jnp.dot(p, v, preferred_element_type=jnp.float32)  # (TQ, d_v) f32
    ctx_ref[0] = ctx.astype(ctx_ref.dtype)
    attn_ref[0] = p.astype(attn_ref.dtype)                   # no-op cast normally


# ---------------------------------------------------------------------------
# Tiling / VMEM sizing helpers
# ---------------------------------------------------------------------------
def _physical_vmem_bytes():
    """Per-generation physical VMEM (v5e/v6e: 128 MiB, v7x: 64 MiB)."""
    try:
        info = pltpu.get_tpu_info()
        for attr in ("vmem_capacity_bytes", "vmem_size_bytes", "vmem_bytes"):
            val = getattr(info, attr, None)
            if val:
                return int(val)
    except Exception:
        pass
    return 64 * 1024 * 1024      # conservative default (v7x-sized)


def _estimate_vmem_bytes(tq, S, dk, dv, in_bytes, out_bytes):
    """Rough per-step VMEM working set: f32 intermediates + double-buffered blocks."""
    f32_work = 4 * tq * S * 4                      # scores / exp / probs / slack
    dbuf = 2 * (                                   # double-buffered pipeline blocks
        tq * dk * in_bytes                         # Q tile
        + S * dk * in_bytes                        # full K
        + S * dv * in_bytes                        # full V
        + tq * S * 1                               # int8 mask tile
        + tq * dv * out_bytes                      # ctx tile
        + tq * S * out_bytes                       # attn tile
    )
    return f32_work + dbuf


def _pick_query_tile(S, dk, dv, in_bytes, out_bytes, budget):
    # TQ must be a multiple of 32 (int8 mask sublane packing; also covers the
    # bf16 / f32 minima) OR exactly S (full-dim blocks are always legal).
    candidates = [c for c in (512, 384, 256, 224, 192, 160, 128, 96, 64, 32)
                  if S % c == 0]
    for tq in candidates:                # largest tile that fits the VMEM budget
        if _estimate_vmem_bytes(tq, S, dk, dv, in_bytes, out_bytes) <= budget:
            return tq
    if candidates:
        return candidates[-1]            # smallest legal divisor (compiler may spill)
    # Small / awkward S (no multiple-of-32 divisor): use the full query axis.
    return S


# ---------------------------------------------------------------------------
# Wrapper
# ---------------------------------------------------------------------------
def scaled_dot_product_attention(Q, K, V, attention_mask, d_K, *,
                                 tq=None, compute_dtype=None,
                                 approx_reciprocal=True):
    """Q, K: [B,H,S,d_K]; V: [B,H,S,d_V]; attention_mask: bool [B,H,S,S],
    [B,1,S,S] or [B,S,S] (True = masked out).

    Returns (context [B,H,S,d_V], attention [B,H,S,S]) in the compute dtype
    (the caller's dtype unless compute_dtype is given, e.g. bf16 for f32 Q/K/V).
    approx_reciprocal=True uses the EUP approximate reciprocal in the softmax
    (rows sum to 1 within ~1e-3); pass False for exact-division parity.
    """
    B, H, S, dk = Q.shape
    dv = V.shape[-1]
    BH = B * H

    # Optional bf16 compute path for f32 callers (MXU is bf16-native and the
    # O(S^2) attention writeback halves); f32 accumulation / softmax in-kernel.
    if compute_dtype is not None:
        Q = Q.astype(compute_dtype)
        K = K.astype(compute_dtype)
        V = V.astype(compute_dtype)
    out_dtype = Q.dtype

    q = Q.reshape(BH, S, dk)
    k = K.reshape(BH, S, dk)
    v = V.reshape(BH, S, dv)

    # Mask as int8 (4x less HBM/VMEM than int32).  Head-invariant masks are
    # streamed as [B,S,S] and reused for all H heads via the index_map instead
    # of materializing the H-fold-replicated [B*H,S,S] stream.
    if attention_mask.ndim == 3:
        mask = attention_mask.astype(jnp.int8)               # [B,S,S]
        per_head = False
    elif attention_mask.shape[1] == 1:
        mask = attention_mask[:, 0].astype(jnp.int8)          # [B,S,S]
        per_head = False
    else:
        mask = attention_mask.reshape(BH, S, S).astype(jnp.int8)
        per_head = True

    in_bytes = jnp.dtype(q.dtype).itemsize
    out_bytes = jnp.dtype(out_dtype).itemsize

    # ~85% of physical VMEM, capped at 112 MiB: ~108 MiB on v5e/v6e (128 MiB
    # physical), ~54 MiB on v7x (64 MiB physical).
    phys_vmem = _physical_vmem_bytes()
    vmem_limit = max(min(int(phys_vmem * 0.85), 112 * 1024 * 1024),
                     32 * 1024 * 1024)

    if tq is None:
        tq = _pick_query_tile(S, dk, dv, in_bytes, out_bytes,
                              budget=int(vmem_limit * 0.9))
    assert S % tq == 0, "query tile must divide sequence length"
    n_q = S // tq

    scale = 1.0 / math.sqrt(d_K)
    kernel = functools.partial(_sdpa_kernel, scale=scale,
                               approx_recip=approx_reciprocal)

    if per_head:
        mask_map = lambda i, j: (i, j, 0)          # mask is [BH, S, S]
    else:
        mask_map = lambda i, j: (i // H, j, 0)     # mask is [B, S, S], reuse per head

    # TODO(synk): for head dims < 128 the ctx output is not lane-dense (masked
    # vst.msk stores); making it dense needs a grid over B with all H heads of a
    # batch resident per step ((tq, H*d_V) output blocks) — not restructured here.
    ctx, attn = pl.pallas_call(
        kernel,
        out_shape=(
            jax.ShapeDtypeStruct((BH, S, dv), out_dtype),
            jax.ShapeDtypeStruct((BH, S, S), out_dtype),
        ),
        grid=(BH, n_q),
        in_specs=[
            pl.BlockSpec((1, tq, dk), lambda i, j: (i, j, 0)),   # Q tile
            pl.BlockSpec((1, S, dk), lambda i, j: (i, 0, 0)),    # full K
            pl.BlockSpec((1, S, dv), lambda i, j: (i, 0, 0)),    # full V
            pl.BlockSpec((1, tq, S), mask_map),                  # mask tile
        ],
        out_specs=(
            pl.BlockSpec((1, tq, dv), lambda i, j: (i, j, 0)),   # context
            pl.BlockSpec((1, tq, S), lambda i, j: (i, j, 0)),    # attention
        ),
        compiler_params=pltpu.CompilerParams(
            # Disjoint output blocks on both axes; BH is the leading axis so
            # megacore (v7x) shards heads, reusing each head's K/V on one core.
            dimension_semantics=("parallel", "parallel"),
            vmem_limit_bytes=vmem_limit,
        ),
    )(q, k, v, mask)

    return ctx.reshape(B, H, S, dv), attn.reshape(B, H, S, S)


# ---------------------------------------------------------------------------
# Pure-JAX reference (mirrors the PyTorch module)
# ---------------------------------------------------------------------------
def _reference(Q, K, V, attention_mask, d_K):
    scores = jnp.einsum("bhqd,bhkd->bhqk", Q, K) / math.sqrt(d_K)
    if attention_mask.ndim == 3:
        attention_mask = attention_mask[:, None]
    scores = jnp.where(attention_mask, -1.0e9, scores)
    attn = jax.nn.softmax(scores, axis=-1)
    ctx = jnp.einsum("bhqk,bhkd->bhqd", attn, V)
    return ctx, attn


if __name__ == "__main__":
    # --- test 1: small shapes, full per-head [B,H,S,S] mask -----------------
    B, H, S, d_K, d_V = 2, 2, 8, 16, 16
    key = jax.random.PRNGKey(0)
    kq, kk, kv, km = jax.random.split(key, 4)
    Q = jax.random.normal(kq, (B, H, S, d_K), dtype=jnp.float32)
    K = jax.random.normal(kk, (B, H, S, d_K), dtype=jnp.float32)
    V = jax.random.normal(kv, (B, H, S, d_V), dtype=jnp.float32)
    attention_mask = jax.random.uniform(km, (B, H, S, S)) < 0.2   # ~20% masked

    ctx, attn = scaled_dot_product_attention(Q, K, V, attention_mask, d_K)
    jax.block_until_ready((ctx, attn))

    ctx_ref, attn_ref = _reference(Q, K, V, attention_mask, d_K)
    # Tolerance accounts for the EUP approximate reciprocal in the softmax.
    assert jnp.allclose(ctx, ctx_ref, atol=2e-3, rtol=2e-3)
    assert jnp.allclose(attn, attn_ref, atol=2e-3, rtol=2e-3)

    # --- test 2: longer sequence (query-axis tiling) + head-broadcast mask --
    B2, H2, S2, d2 = 1, 2, 1024, 64
    kq2, kk2, kv2, km2 = jax.random.split(jax.random.PRNGKey(1), 4)
    Q2 = jax.random.normal(kq2, (B2, H2, S2, d2), dtype=jnp.float32)
    K2 = jax.random.normal(kk2, (B2, H2, S2, d2), dtype=jnp.float32)
    V2 = jax.random.normal(kv2, (B2, H2, S2, d2), dtype=jnp.float32)
    mask2 = jax.random.uniform(km2, (B2, 1, S2, S2)) < 0.15       # head-invariant

    ctx2, attn2 = scaled_dot_product_attention(Q2, K2, V2, mask2, d2)
    jax.block_until_ready((ctx2, attn2))

    ctx2_ref, attn2_ref = _reference(Q2, K2, V2, mask2, d2)
    assert jnp.allclose(ctx2, ctx2_ref, atol=2e-3, rtol=2e-3)
    assert jnp.allclose(attn2, attn2_ref, atol=2e-3, rtol=2e-3)

    print("KERNEL_OK")
</pallas_src>

<mosaic_0001>
module attributes {stable_mosaic.version = 11 : i64} {
  func.func @_sdpa_kernel(%arg0: i32, %arg1: i32, %arg2: memref<1x8x16xf32, #tpu.memory_space<vmem>>, %arg3: memref<1x8x16xf32, #tpu.memory_space<vmem>>, %arg4: memref<1x8x16xf32, #tpu.memory_space<vmem>>, %arg5: memref<1x8x8xi8, #tpu.memory_space<vmem>>, %arg6: memref<1x8x16xf32, #tpu.memory_space<vmem>>, %arg7: memref<1x8x8xf32, #tpu.memory_space<vmem>>) attributes {dimension_semantics = [#tpu.dimension_semantics<parallel>, #tpu.dimension_semantics<parallel>], iteration_bounds = array<i64: 4, 1>, scalar_prefetch = 0 : i64, scratch_operands = 0 : i64, tpu.core_type = #tpu.core_type<tc>, window_params = [{transform_indices = @transform_0, window_bounds = array<i64: 1, 8, 16>}, {transform_indices = @transform_1, window_bounds = array<i64: 1, 8, 16>}, {transform_indices = @transform_2, window_bounds = array<i64: 1, 8, 16>}, {transform_indices = @transform_3, window_bounds = array<i64: 1, 8, 8>}, {transform_indices = @transform_4, window_bounds = array<i64: 1, 8, 16>}, {transform_indices = @transform_5, window_bounds = array<i64: 1, 8, 8>}]} {
    %c0 = arith.constant 0 : index
    %c0_0 = arith.constant 0 : index
    %c0_1 = arith.constant 0 : index
    %0 = vector.load %arg2[%c0, %c0_0, %c0_1] : memref<1x8x16xf32, #tpu.memory_space<vmem>>, vector<1x8x16xf32>
    %1 = vector.shape_cast %0 : vector<1x8x16xf32> to vector<8x16xf32>
    %cst = arith.constant 2.500000e-01 : f32
    %2 = vector.broadcast %cst : f32 to vector<8x16xf32>
    %3 = arith.mulf %1, %2 : vector<8x16xf32>
    %c0_2 = arith.constant 0 : index
    %c0_3 = arith.constant 0 : index
    %c0_4 = arith.constant 0 : index
    %4 = vector.load %arg3[%c0_2, %c0_3, %c0_4] : memref<1x8x16xf32, #tpu.memory_space<vmem>>, vector<1x8x16xf32>
    %5 = vector.shape_cast %4 : vector<1x8x16xf32> to vector<8x16xf32>
    %c0_5 = arith.constant 0 : index
    %c0_6 = arith.constant 0 : index
    %c0_7 = arith.constant 0 : index
    %6 = vector.load %arg4[%c0_5, %c0_6, %c0_7] : memref<1x8x16xf32, #tpu.memory_space<vmem>>, vector<1x8x16xf32>
    %7 = vector.shape_cast %6 : vector<1x8x16xf32> to vector<8x16xf32>
    %c0_8 = arith.constant 0 : index
    %c0_9 = arith.constant 0 : index
    %c0_10 = arith.constant 0 : index
    %8 = vector.load %arg5[%c0_8, %c0_9, %c0_10] : memref<1x8x8xi8, #tpu.memory_space<vmem>>, vector<1x8x8xi8>
    %9 = vector.shape_cast %8 : vector<1x8x8xi8> to vector<8x8xi8>
    %cst_11 = arith.constant dense<0.000000e+00> : vector<8x8xf32>
    %10 = tpu.matmul %3, %5, %cst_11 {dimension_numbers = #tpu.dot_dimension_numbers<[1], [1], [0], [0], [0, 0, 1, 0], [], []>} : vector<8x16xf32>, vector<8x16xf32>, vector<8x8xf32> -> vector<8x8xf32>
    %c0_i8 = arith.constant 0 : i8
    %11 = vector.broadcast %c0_i8 : i8 to vector<8x8xi8>
    %12 = arith.cmpi ne, %9, %11 : vector<8x8xi8>
    %cst_12 = arith.constant -1.000000e+09 : f32
    %13 = vector.broadcast %cst_12 : f32 to vector<8x8xf32>
    %14 = arith.select %12, %13, %10 : vector<8x8xi1>, vector<8x8xf32>
    %cst_13 = arith.constant dense<0xFF800000> : vector<8xf32>
    %15 = vector.multi_reduction <maximumf>, %14, %cst_13 [1] : vector<8x8xf32> to vector<8xf32>
    %16 = vector.shape_cast %15 : vector<8xf32> to vector<8x1xf32>
    %17 = vector.broadcast %16 : vector<8x1xf32> to vector<8x8xf32>
    %18 = arith.subf %14, %17 : vector<8x8xf32>
    %19 = math.exp %18 : vector<8x8xf32>
    %cst_14 = arith.constant dense<0.000000e+00> : vector<8xf32>
    %20 = vector.multi_reduction <add>, %19, %cst_14 [1] : vector<8x8xf32> to vector<8xf32>
    %21 = vector.shape_cast %20 : vector<8xf32> to vector<8x1xf32>
    %22 = tpu.reciprocal %21 {approx = true} : vector<8x1xf32> -> vector<8x1xf32>
    %23 = vector.broadcast %22 : vector<8x1xf32> to vector<8x8xf32>
    %24 = arith.mulf %19, %23 : vector<8x8xf32>
    %cst_15 = arith.constant dense<0.000000e+00> : vector<8x16xf32>
    %25 = tpu.matmul %24, %7, %cst_15 {dimension_numbers = #tpu.dot_dimension_numbers<[1], [0], [0], [1], [0, 0, 1, 1], [], []>} : vector<8x8xf32>, vector<8x16xf32>, vector<8x16xf32> -> vector<8x16xf32>
    %c0_16 = arith.constant 0 : index
    %c0_17 = arith.constant 0 : index
    %c0_18 = arith.constant 0 : index
    %26 = vector.load %arg6[%c0_16, %c0_17, %c0_18] : memref<1x8x16xf32, #tpu.memory_space<vmem>>, vector<1x8x16xf32>
    %27 = vector.shape_cast %26 : vector<1x8x16xf32> to vector<8x16xf32>
    %28 = vector.shape_cast %25 : vector<8x16xf32> to vector<1x8x16xf32>
    tpu.vector_store %arg6[%c0_16, %c0_17, %c0_18], %28 {strides = array<i32>} : memref<1x8x16xf32, #tpu.memory_space<vmem>>, vector<1x8x16xf32>,
    %c0_19 = arith.constant 0 : index
    %c0_20 = arith.constant 0 : index
    %c0_21 = arith.constant 0 : index
    %29 = vector.load %arg7[%c0_19, %c0_20, %c0_21] : memref<1x8x8xf32, #tpu.memory_space<vmem>>, vector<1x8x8xf32>
    %30 = vector.shape_cast %29 : vector<1x8x8xf32> to vector<8x8xf32>
    %31 = vector.shape_cast %24 : vector<8x8xf32> to vector<1x8x8xf32>
    tpu.vector_store %arg7[%c0_19, %c0_20, %c0_21], %31 {strides = array<i32>} : memref<1x8x8xf32, #tpu.memory_space<vmem>>, vector<1x8x8xf32>,
    return
  }
  func.func @transform_0(%arg0: i32, %arg1: i32) -> (i32, i32, i32) {
    %c0_i32 = arith.constant 0 : i32
    %c0_i32_0 = arith.constant 0 : i32
    return %arg0, %arg1, %c0_i32 : i32, i32, i32
  }
  func.func @transform_1(%arg0: i32, %arg1: i32) -> (i32, i32, i32) {
    %c0_i32 = arith.constant 0 : i32
    %c0_i32_0 = arith.constant 0 : i32
    %c0_i32_1 = arith.constant 0 : i32
    return %arg0, %c0_i32, %c0_i32_0 : i32, i32, i32
  }
  func.func @transform_2(%arg0: i32, %arg1: i32) -> (i32, i32, i32) {
    %c0_i32 = arith.constant 0 : i32
    %c0_i32_0 = arith.constant 0 : i32
    %c0_i32_1 = arith.constant 0 : i32
    return %arg0, %c0_i32, %c0_i32_0 : i32, i32, i32
  }
  func.func @transform_3(%arg0: i32, %arg1: i32) -> (i32, i32, i32) {
    %c0_i32 = arith.constant 0 : i32
    %c0_i32_0 = arith.constant 0 : i32
    return %arg0, %arg1, %c0_i32 : i32, i32, i32
  }
  func.func @transform_4(%arg0: i32, %arg1: i32) -> (i32, i32, i32) {
    %c0_i32 = arith.constant 0 : i32
    %c0_i32_0 = arith.constant 0 : i32
    return %arg0, %arg1, %c0_i32 : i32, i32, i32
  }
  func.func @transform_5(%arg0: i32, %arg1: i32) -> (i32, i32, i32) {
    %c0_i32 = arith.constant 0 : i32
    %c0_i32_0 = arith.constant 0 : i32
    return %arg0, %arg1, %c0_i32 : i32, i32, i32
  }
}

</mosaic_0001>

<bundles_post_ra>
// kernel: tpu_custom_call.1
= control target key start
LH: loop header
LB: loop body
LE: loop exit
PB: predicated region body
PF: predicated region fallthrough
CT: control target
= control target key end

     0   :  { %s1428_s0 = inlined_call_operand.hbm [shape: f32[4,8,16], index: 0, kind: input, shape index: {}]   ;;  %s1429_s1 = inlined_call_operand.hbm [shape: f32[4,8,16], index: 1, kind: input, shape index: {}]   ;;  %s1430_s2 = inlined_call_operand.hbm [shape: f32[4,8,16], index: 2, kind: input, shape index: {}]   ;;  %s1431_s3 = inlined_call_operand.hbm [shape: s8[4,8,8], index: 3, kind: input, shape index: {}]   ;;  %s1432_s4 = inlined_call_operand.hbm [shape: f32[4,8,16], index: 4, kind: output, shape index: {0}]   ;;  %s1433_s5 = inlined_call_operand.hbm [shape: f32[4,8,8], index: 5, kind: output, shape index: {1}]  }
   0x1   :  { %1438 = sst [smem:[#allocation23_spill]] %s1429_s1 }
   0x2   :  { %11 = vsyncpa [#allocation3], 0 }
   0x3   :  { %13 = vsyncpa [#allocation3 + $0x1], 0 }
   0x4   :  { %14 = vsyncpa [#allocation6], 0 }
   0x5   :  { %16 = vsyncpa [#allocation6 + $0x1], 0 }
   0x6   :  { %17 = vsyncpa [#allocation9], 0 }
   0x7   :  { %19 = vsyncpa [#allocation9 + $0x1], 0 }
   0x8   :  { %20 = vsyncpa [#allocation4], 0 }
   0x9   :  { %22 = vsyncpa [#allocation4 + $0x1], 0 }
   0xa   :  { %23 = vsyncpa [#allocation12], 0 }
   0xb   :  { %25 = vsyncpa [#allocation12 + $0x1], 0  ;;  %s1173_s18 = smov 0   ;;  %s1175_s19 = smov 0  }
   0xc   :  { %s1177_s20 = smov 0   ;;  %s1179_s21 = smov 0  }
   0xd   :  { %s1181_s22 = smov 0   ;;  %s1183_s23 = smov 0  }
   0xe LB: > { %1439 = sst [smem:[#allocation18_spill]] %s1112_s18  ;;  %s1204_s24 = sadd.s32 4294967295, %s1132_s23   ;;  %s1132_s23 = sphi %s1183_s23, %s31_s23   ;;  %s1128_s22 = sphi %s1181_s22, %s1459_s22   ;;  %s1124_s21 = sphi %s1179_s21, %s1458_s21   ;;  %s1120_s20 = sphi %s1177_s20, %s1454_s20   ;;  %s1116_s19 = sphi %s1175_s19, %s1457_s19   ;;  %s1112_s18 = sphi %s1173_s18, %s1456_s18  }
   0xf   : > { %1440 = sst [smem:[#allocation19_spill]] %s1120_s20  ;;  %s772_s25 = sadd.s32 4294967294, %s1132_s23  }
  0x10   : > { %s43_s26 = sadd.s32 1, %s1128_s22  ;;  %s52_s27 = sadd.s32 1, %s1120_s20 }
  0x11   : > { %p45_p0 = scmp.ge.s32.totalorder %s43_s26, 4  ;;  %p59_p1 = scmp.ne.s32.totalorder %s1120_s20, %s1116_s19 }
  0x12   : > { %p60_p2 = scmp.eq.s32.totalorder %s1132_s23, 0  ;;  %p65_p3 = scmp.ne.s32.totalorder %s1116_s19, %s1112_s18 }
  0x13   : > { %s1461_s26 = smov (%p45_p0, %s43_s26), 0  ;;  %p66_p5 = scmp.eq.s32.totalorder %s1204_s24, 0 }
  0x14   : > { %1441 = sst [smem:[#allocation20_spill]] %s1461_s26  ;;  %p1216_p4 = por %p60_p2, %p59_p1 }
  0x15   : > { %s47_s29 = ssub.s32 %s1128_s22, %s1461_s26  ;;  %p171_p6 = scmp.eq.s32.totalorder %s1204_s24, 3 }
  0x16   : > { %p50_p7 = scmp.eq.s32.totalorder %s47_s29, 0  ;;  %p1224_p8 = por %p66_p5, %p65_p3 }
  0x17   : > { %p1228_p9 = por %p171_p6, %p59_p1  ;;  %p177_p10 = scmp.eq.s32.totalorder %s772_s25, 3 }
  0x18   : > { %s1233_s7 = scalar_select %p50_p7, %s1120_s20, %s52_s27  }
  0x19   : > { %p1235_p11 = por %p177_p10, %p65_p3  ;;  %p845_p12 = scmp.lt.s32.totalorder %s1132_s23, 4 }
  0x1a   : > { %1445 = sst [smem:[#allocation21_spill]] %s1233_s7  ;;  %s1241_s9 = sand.u32 1, %s1120_s20  }
  0x1b   : > { %s1446_s8 = scalar_select %p1235_p11, 1, 0 }
  0x1c   : > { %s1244_s10 = sshll.u32 %s1241_s9, 3  ;;  %s1247_s11 = sshll.u32 %s1128_s22, 7 }
  0x1d   : > { %1447 = sst [smem:[#allocation22_spill]] %s1446_s8  ;;  %p1251_p13 = pnand %p845_p12, %p1216_p4 }
  0x1e   : > { %s244_s13 = sand.u32 1, %s1132_s23   ;;  %s1449_s1 = sld [smem:[#allocation23_spill]] }
  0x1f   : > { %s248_s17 = scalar_lea.vmem [#allocation5], %s1244_s10  ;;  %p783_p0 = scmp.ge.s32.totalorder %s1132_s23, 1 }
  0x20   : > { %s255_s25 = sshll.u32 %s248_s17, 4  ;;  %p297_p1 = scmp.lt.s32.totalorder %s1132_s23, 5  ;;  %s256_s25 = int_to_ptr.vmem [resolvable:$true] %s255_s25 }
  0x21   : > { %s1263_s27 = scalar_lea.sflag [#allocation6], %s244_s13  ;;  %p904_p2 = pneg %p1251_p13 }
  0x22   : > { %s915_s28 = scalar_lea.vmem %s256_s25, 128  ;;  %s1134_s29 = smov [#allocation5]  }
  0x23   : > { %p916_p3 = scmp.ne.s32.totalorder %s256_s25, %s915_s28  ;;  %s920_s26 = sshll.u32 %s1134_s29, 4  ;;  %s921_s26 = int_to_ptr.vmem [resolvable:$false] %s920_s26 }
  0x24   : > { %s253_s16 = scalar_lea.hbm %s1449_s1, %s1247_s11  ;;  %s922_s14 = scalar_lea.vmem %s921_s26, 256 }
  0x25   : > { %p918_p4 = pnand %p916_p3, %p904_p2  ;;  %p923_p6 = scmp.lt.s32.totalorder %s256_s25, %s921_s26 }
  0x26   : > { %p924_p7 = scmp.lt.s32.totalorder %s922_s14, %s915_s28 }
  0x27   : > { %p919_p5 = pneg %p918_p4 }
  0x28   : > { %p925_p10 = por %p924_p7, %p923_p6 }
  0x2a   : > { %p926_p12 = pnand %p925_p10, %p919_p5 }
  0x2c   : > { %929 = shalt.err (!%p926_p12)
}
  0x2d   : > { %831 = dma.hbm_to_vmem [thread:$0]  (!%p1251_p13), %s253_s16, 128, %s256_s25, %s1263_s27  }
  0x2e   : > { %p1277_p3 = pnand %p783_p0, %p297_p1  ;;  %s235_s17 = scalar_lea.hbm %s1428_s0, %s1247_s11 }
  0x2f   : > { %s229_s28 = scalar_lea.vmem [#allocation2], %s1244_s10  ;;  %s271_s7 = scalar_lea.hbm %s1430_s2, %s1247_s11 }
  0x30   : > { %s237_s29 = sshll.u32 %s229_s28, 4  ;;  %s226_s20 = scalar_lea.sflag [#allocation3], %s1241_s9  ;;  %s238_s29 = int_to_ptr.vmem [resolvable:$true] %s237_s29 }
  0x31   : > { %s943_s8 = scalar_lea.vmem %s238_s29, 128  ;;  %s1135_s16 = smov [#allocation2]  }
  0x32   : > { %p944_p4 = scmp.ne.s32.totalorder %s238_s29, %s943_s8  ;;  %s948_s25 = sshll.u32 %s1135_s16, 4  ;;  %s949_s25 = int_to_ptr.vmem [resolvable:$false] %s948_s25 }
  0x33   : > { %s950_s18 = scalar_lea.vmem %s949_s25, 256  ;;  %p951_p5 = scmp.lt.s32.totalorder %s238_s29, %s949_s25 }
  0x34   : > { %p946_p0 = pnand %p944_p4, %p904_p2  ;;  %p952_p6 = scmp.lt.s32.totalorder %s950_s18, %s943_s8 }
  0x36   : > { %p947_p1 = pneg %p946_p0  ;;  %p953_p7 = por %p952_p6, %p951_p5 }
  0x38   : > { %p954_p10 = pnand %p953_p7, %p947_p1 }
  0x3a   : > { %957 = shalt.err (!%p954_p10)
}
  0x3b   : > { %828 = dma.hbm_to_vmem [thread:$0]  (!%p1251_p13), %s235_s17, 128, %s238_s29, %s226_s20  }
  0x3c   : > { %s266_s1 = scalar_lea.vmem [#allocation7], %s1244_s10  ;;  %s781_s15 = sshll.u32 %s1241_s9, 1 }
  0x3d   : > { %s273_s26 = sshll.u32 %s266_s1, 4  ;;  %s1136_s18 = smov [#allocation7]   ;;  %s274_s26 = int_to_ptr.vmem [resolvable:$true] %s273_s26 }
  0x3e   : > { %s971_s28 = scalar_lea.vmem %s274_s26, 128  ;;  %s976_s8 = sshll.u32 %s1136_s18, 4  ;;  %s977_s8 = int_to_ptr.vmem [resolvable:$false] %s976_s8 }
  0x3f   : > { %p972_p12 = scmp.ne.s32.totalorder %s274_s26, %s971_s28  ;;  %s978_s14 = scalar_lea.vmem %s977_s8, 256 }
  0x40   : > { %p979_p1 = scmp.lt.s32.totalorder %s274_s26, %s977_s8  ;;  %p980_p5 = scmp.lt.s32.totalorder %s978_s14, %s971_s28 }
  0x41   : > { %p974_p4 = pnand %p972_p12, %p904_p2 }
  0x42   : > { %p981_p6 = por %p980_p5, %p979_p1 }
  0x43   : > { %p975_p0 = pneg %p974_p4 }
  0x45   : > { %p982_p7 = pnand %p981_p6, %p975_p0 }
  0x47   : > { %985 = shalt.err (!%p982_p7)
}
  0x48   : > { %834 = dma.hbm_to_vmem [thread:$0]  (!%p1251_p13), %s271_s7, 128, %s274_s26, %s1263_s27  }
  0x49   : > { %s782_s17 = sshll.u32 %s1128_s22, 5  ;;  %s284_s1 = scalar_lea.vmem [#allocation8], %s781_s15 }
  0x4a   : > { %s290_s25 = scalar_lea.hbm %s1431_s3, %s782_s17  ;;  %s292_s28 = sshll.u32 %s284_s1, 4  ;;  %s293_s28 = int_to_ptr.vmem [resolvable:$true] %s292_s28 }
  0x4b   : > { %s281_s18 = scalar_lea.sflag [#allocation9], %s1241_s9  ;;  %s999_s8 = scalar_lea.vmem %s293_s28, 32 }
  0x4c   : > { %p1000_p10 = scmp.ne.s32.totalorder %s293_s28, %s999_s8  ;;  %s1137_s11 = smov [#allocation8]  }
  0x4d   : > { %s1004_s14 = sshll.u32 %s1137_s11, 4  ;;  %s1005_s14 = int_to_ptr.vmem [resolvable:$false] %s1004_s14 }
  0x4e   : > { %p1002_p12 = pnand %p1000_p10, %p904_p2  ;;  %s1006_s20 = scalar_lea.vmem %s1005_s14, 64 }
  0x4f   : > { %p1007_p0 = scmp.lt.s32.totalorder %s293_s28, %s1005_s14  ;;  %p1008_p1 = scmp.lt.s32.totalorder %s1006_s20, %s999_s8 }
  0x50   : > { %p1003_p4 = pneg %p1002_p12 }
  0x51   : > { %p1009_p5 = por %p1008_p1, %p1007_p0 }
  0x53   : > { %p1010_p6 = pnand %p1009_p5, %p1003_p4 }
  0x55   : > { %1013 = shalt.err (!%p1010_p6)
}
  0x56   : > { %837 = dma.hbm_to_vmem [thread:$0]  (!%p1251_p13), %s290_s25, 32, %s293_s28, %s281_s18  }
  0x57   : > { %301 = sbr.rel (%p1277_p3) target bundleno = 818 (0x332), region = 36  ;;  %s1322_s7 = sand.u32 (!%p1277_p3), 1, %s1116_s19  }
  0x58   : > { %s1325_s9 = sshll.u32 (!%p1277_p3), %s1322_s7, 3  ;;  %s304_s27 = scalar_lea.sflag (!%p1277_p3), [#allocation3], %s1322_s7 }
  0x59   : > { %s307_s26 = scalar_lea.vmem (!%p1277_p3), [#allocation2], %s1325_s9 }
  0x5c   : > { %1091 = dma.done.wait (%p1224_p8), %s304_s27, 128  }
  0x5d   : > { %1093 = vsyncadd (%p1224_p8), %s304_s27, 4294967168  ;;  %s312_s12 = sand.u32 1, %s1204_s24   ;;  %s316_s15 = scalar_lea.vmem [#allocation5], %s1325_s9 }
  0x5e   : > { %s313_s13 = scalar_lea.sflag [#allocation6], %s312_s12 }
  0x5f   : > { %1095 = dma.done.wait (%p1224_p8), %s313_s13, 256  }
  0x60   : > { %1097 = vsyncadd (%p1224_p8), %s313_s13, 4294967040  ;;  %s787_s10 = sshll.u32 %s1322_s7, 1  ;;  %s325_s17 = scalar_lea.vmem [#allocation7], %s1325_s9 }
  0x61   : > { %s331_s29 = scalar_lea.sflag [#allocation9], %s1322_s7  ;;  %s334_s16 = scalar_lea.vmem [#allocation8], %s787_s10 }
  0x62   : > { %1099 = dma.done.wait (%p1224_p8), %s331_s29, 32  }
  0x63   : > { %1101 = vsyncadd (%p1224_p8), %s331_s29, 4294967264  ;;  %v1138_v0 = vmov 0.0   ;;  %vm1139_vm0 = vmmov 0   ;;  %vm388_vm1 = vcmask 130048   ;;  %v385_v1 = vld [vmem:[%s316_s15] sm:$0xff]  ;;  %v383_v2 = vld [vmem:[%s307_s26] sm:$0xff] }
  0x64   : > { %803 = vmatprep.subr.mxu0 %v1138_v0  ;;  %805 = vmatprep.mubr.msk.f32.mxu0 %vm1139_vm0, %v1138_v0  ;;  %v384_v3 = vmul.f32 0.25, %v383_v2  ;;  %v387_v4 = vld [vmem:[%s334_s16] sm:$0x3]  ;;  %v1140_v5 = vmov 0   ;;  %vm470_vm4 = vcmask 64512   ;;  %v386_v17 = vld [vmem:[%s325_s17] sm:$0xff] }
  0x65   : > { %808 = vmatprep.subr.mxu1 %v1138_v0  ;;  %810 = vmatprep.mubr.msk.f32.mxu1 %vm1139_vm0, %v1138_v0  ;;  %vm465_vm2 = vnez %v387_v4  ;;  %s380_s24 = scalar_lea.vmem [#allocation11], %s1325_s9  ;;  %s795_s30 = sshll.u32 %s1124_s21, 7 }
  0x66   : > { %804 = vmatpush3.xpose.msk.msra.mxu0 %vm388_vm1, %v385_v1  ;;  %v466_v6 = vsel %vm465_vm2, 16843009, %v1140_v5  ;;  %809 = vmatpush3.msra.mxu1 %v386_v17  ;;  %s589_s28 = scalar_lea.hbm %s1433_s5, %s795_s30  ;;  %s591_s18 = sshll.u32 %s380_s24, 4  ;;  %s592_s18 = int_to_ptr.vmem [resolvable:$true] %s591_s18 }
  0x67   : > { %v467_v7 = vunpack.c.0.s8 %v466_v6  ;;  %s563_s8 = scalar_lea.sflag [#allocation12], %s1322_s7  ;;  %s1014_s11 = scalar_lea.vmem %s592_s18, 128 }
  0x68   : > { %p1015_p8 = scmp.ne.s32.totalorder %s592_s18, %s1014_s11  ;;  %s1141_s14 = smov [#allocation11]  }
  0x69   : > { %806 = vmatmul.mubr.msk.f32.vlgmr.msra.gmra.mxu0 %vm388_vm1, %v384_v3  ;;  %vm468_vm3 = vcmp.ne.s32.totalorder %v467_v7, 0  ;;  %s1018_s20 = sshll.u32 %s1141_s14, 4  ;;  %s1019_s20 = int_to_ptr.vmem [resolvable:$false] %s1018_s20 }
  0x6a   : > { %p1016_p13 = pnand %p1015_p8, %p1228_p9  ;;  %s1020_s27 = scalar_lea.vmem %s1019_s20, 256 }
  0x6b   : > { %p1021_p3 = scmp.lt.s32.totalorder %s592_s18, %s1019_s20  ;;  %p1022_p7 = scmp.lt.s32.totalorder %s1020_s27, %s1014_s11 }
  0x6c   : > { %p1017_p2 = pneg %p1016_p13 }
  0x6d   : > { %p1023_p10 = por %p1022_p7, %p1021_p3 }
  0x6f   : > { %p1024_p12 = pnand %p1023_p10, %p1017_p2 }
 0x129   : > { %v461_v8 = vpop.f32.mrf.mxu0 }
 0x12a   : > { %v469_v9 = vsel %vm468_vm3, -1e+09, %v461_v8 }
 0x12b   : > { %v807_v10 = vpop.f32.mrf.mxu0  ;;  %v471_v11 = vsel %vm470_vm4, %v469_v9, -inf }
 0x12c   : > { %472 = vmax.xlane.f32.xlu0 %v471_v11 }
 0x1b5   : > { %v473_v12 = vpop.xlane.xlu0 %472 }
 0x1b6   : > { %v474_v13 = vsub.f32 %v469_v9, %v473_v12 }
 0x1b8   : > { %v475_v14 = vmul.f32 1.442695, %v474_v13 }
 0x1ba   : > { %898 = vpow2.f32 %v475_v14 }
 0x1c7   : > { %v899_v15 = vpop.eup %898 }
 0x1c8   : > { %v477_v16 = vsel %vm470_vm4, %v899_v15, 0.0 }
 0x1c9   : > { %478 = vadd.xlane.f32.xlu0 %v477_v16 }
 0x252   : > { %v479_v18 = vpop.xlane.xlu0 %478 }
 0x253   : > { %900 = vrcp.f32 %v479_v18 }
 0x260   : > { %v901_v19 = vpop.eup %900 }
 0x261   : > { %v481_v20 = vmul.f32 %v901_v19, %v899_v15 }
 0x263   : > { %811 = vmatmul.mubr.msk.f32.vlgmr.msra.gmra.mxu1 %vm470_vm4, %v481_v20  ;;  %556 = vst.msk [vmem:[%s380_s24] sm:$0xff] %vm470_vm4, %v481_v20 }
 0x264   : > { %1027 = shalt.err (!%p1024_p12)
}
 0x265   : > { %s1028_s26 = scalar_lea.hbm %s589_s28, 128  ;;  %s1032_s15 = scalar_lea.hbm %s1433_s5, 512 }
 0x266   : > { %p1029_p4 = scmp.ne.s32.totalorder %s589_s28, %s1028_s26  ;;  %p1033_p5 = scmp.lt.s32.totalorder %s589_s28, %s1433_s5 }
 0x267   : > { %p1034_p6 = scmp.lt.s32.totalorder %s1032_s15, %s1028_s26 }
 0x268   : > { %p1030_p0 = pnand %p1029_p4, %p1228_p9 }
 0x269   : > { %p1035_p8 = por %p1034_p6, %p1033_p5 }
 0x26a   : > { %p1031_p1 = pneg %p1030_p0 }
 0x26c   : > { %p1036_p13 = pnand %p1035_p8, %p1031_p1 }
 0x26e   : > { %1039 = shalt.err (!%p1036_p13)
}
 0x26f   : > { %822 = dma.vmem_to_hbm [thread:$0]  (%p1228_p9), %s592_s18, 128, %s589_s28, %s563_s8  }
 0x270   : > { %s373_s29 = scalar_lea.vmem [#allocation10], %s1325_s9  ;;  %s1380_s1 = scalar_lea.hbm %s1432_s4, %s795_s30 }
 0x271   : > { %s577_s16 = sshll.u32 %s373_s29, 4  ;;  %s558_s11 = scalar_lea.sflag [#allocation4], %s1322_s7  ;;  %s1382_s16 = int_to_ptr.vmem [resolvable:$true] %s577_s16 }
 0x272   : > { %s1040_s14 = scalar_lea.vmem %s1382_s16, 128  ;;  %s1142_s21 = smov [#allocation10]  }
 0x273   : > { %p1041_p2 = scmp.ne.s32.totalorder %s1382_s16, %s1040_s14  ;;  %s1044_s9 = sshll.u32 %s1142_s21, 4  ;;  %s1045_s9 = int_to_ptr.vmem [resolvable:$false] %s1044_s9 }
 0x274   : > { %s1046_s30 = scalar_lea.vmem %s1045_s9, 256  ;;  %p1047_p10 = scmp.lt.s32.totalorder %s1382_s16, %s1045_s9 }
 0x275   : > { %p1042_p3 = pnand %p1041_p2, %p1228_p9  ;;  %p1048_p12 = scmp.lt.s32.totalorder %s1046_s30, %s1040_s14 }
 0x277   : > { %p1043_p7 = pneg %p1042_p3  ;;  %p1049_p4 = por %p1048_p12, %p1047_p10 }
 0x279   : > { %p1050_p0 = pnand %p1049_p4, %p1043_p7 }
 0x323   : > { %v551_v21 = vpop.f32.mrf.mxu1 }
 0x324   : > { %555 = vst.msk [vmem:[%s373_s29] sm:$0xff] %vm388_vm1, %v551_v21 }
 0x325   : > { %v812_v22 = vpop.f32.mrf.mxu1 }
 0x326   : > { %1053 = shalt.err (!%p1050_p0)
}
 0x327   : > { %s1054_s28 = scalar_lea.hbm %s1380_s1, 128  ;;  %s1058_s8 = scalar_lea.hbm %s1432_s4, 512 }
 0x328   : > { %p1055_p1 = scmp.ne.s32.totalorder %s1380_s1, %s1054_s28  ;;  %p1059_p8 = scmp.lt.s32.totalorder %s1380_s1, %s1432_s4 }
 0x329   : > { %p1060_p13 = scmp.lt.s32.totalorder %s1058_s8, %s1054_s28 }
 0x32a   : > { %p1056_p5 = pnand %p1055_p1, %p1228_p9 }
 0x32b   : > { %p1061_p2 = por %p1060_p13, %p1059_p8 }
 0x32c   : > { %p1057_p6 = pneg %p1056_p5 }
 0x32e   : > { %p1062_p3 = pnand %p1061_p2, %p1057_p6 }
 0x330   : > { %1065 = shalt.err (!%p1062_p3)
}
 0x331   : > { %821 = dma.vmem_to_hbm [thread:$0]  (%p1228_p9), %s1382_s16, 128, %s1380_s1, %s558_s11  }
 0x332 PF: > { %s1451_s26 = sld [smem:[#allocation18_spill]]  ;;  %p846_p7 = scmp.ge.s32.totalorder %s1132_s23, 2 }
 0x334   : > { %p839_p10 = pnand %p846_p7, %p1235_p11 }
 0x336   : > { %p840_p12 = pneg %p839_p10 }
 0x338   : > { %s603_s13 = sand.u32 1, %s1451_s26  }
 0x339   : > { %s604_s15 = scalar_lea.sflag [#allocation4], %s603_s13 }
 0x33a   : > { %1103 = dma.done.wait (%p840_p12), %s604_s15, 128  }
 0x33b   : > { %1105 = vsyncadd (%p840_p12), %s604_s15, 4294967168  ;;  %s613_s10 = scalar_lea.sflag [#allocation12], %s603_s13 }
 0x33c   : > { %1107 = dma.done.wait (%p840_p12), %s613_s10, 128  }
 0x33d   : > { %1109 = vsyncadd (%p840_p12), %s613_s10, 4294967168  ;;  %s31_s23 = sadd.s32 1, %s1132_s23   ;;  %s1453_s6 = sld [smem:[#allocation19_spill]] }
 0x33e   : > { %p28_p4 = scmp.ge.s32.totalorder %s31_s23, 6   ;;  %s1454_s20 = sld [smem:[#allocation21_spill]] }
 0x33f   : > { %s1455_s17 = sld [smem:[#allocation20_spill]]  ;;  %s1456_s18 = smov %s1116_s19 }
 0x340   : > { %s1458_s21 = smov %s1128_s22 }
 0x341   :  { %30 = sbr.rel (!%p28_p4) target bundleno = 14 (0xe), region = 135 }
 0x343   : > { %s1457_s19 = smov %s1453_s6 }
 0x345   : > { %s1459_s22 = smov %s1455_s17 }
 0x346   :  { %618 = vsyncpa [#allocation3], 1 }
 0x347   :  { %620 = vsyncpa [#allocation3 + $0x1], 1 }
 0x348   :  { %621 = vsyncpa [#allocation6], 1 }
 0x349   :  { %623 = vsyncpa [#allocation6 + $0x1], 1 }
 0x34a   :  { %624 = vsyncpa [#allocation9], 1 }
 0x34b   :  { %626 = vsyncpa [#allocation9 + $0x1], 1 }
 0x34c   :  { %627 = vsyncpa [#allocation4], 1 }
 0x34d   :  { %629 = vsyncpa [#allocation4 + $0x1], 1 }
 0x34e   :  { %630 = vsyncpa [#allocation12], 1 }
 0x34f   :  { %632 = vsyncpa [#allocation12 + $0x1], 1 }

</bundles_post_ra>
